<compile_context>
chip_gen: v7x
topology: tpu7x:2x2x1
jax: 0.10.0
libtpu: 0.0.40
codegen_flags: <defaults>
</compile_context>

<pallas_src>
import functools

import jax
import jax.numpy as jnp
from jax import lax
from jax.experimental import pallas as pl
from jax.experimental.pallas import tpu as pltpu

NEG = -1.0e30          # "log(0)" sentinel (avoids inf/nan arithmetic)


def _round_up(x, m):
    return (x + m - 1) // m * m


# --------------------------------------------------------------------------
# Kernel 1: projection head
#   log_softmax( dropout(relu(X^T W1 + b1)) @ W2 + b2 )   over the real vocab
# --------------------------------------------------------------------------
def proj_kernel(x_ref, mask_ref, w1_ref, b1_ref, w2_ref, b2_ref, o_ref, *, v_real):
    x = x_ref[0].astype(jnp.bfloat16)                         # (D, TILE_T)
    # h[t, j] = sum_d x[d, t] * w1[d, j]  -- transpose fused into the contraction.
    h = lax.dot_general(x, w1_ref[...], (((0,), (0,)), ((), ())),
                        preferred_element_type=jnp.float32)   # (TILE_T, D)
    h = jnp.maximum(h + b1_ref[...], 0.0)                     # bias + ReLU (f32)
    h = h * mask_ref[0].astype(jnp.float32)                   # dropout mask in {0, 2}
    z = jnp.dot(h.astype(jnp.bfloat16), w2_ref[...],
                preferred_element_type=jnp.float32) + b2_ref[...]   # (TILE_T, V_pad)
    lane = lax.broadcasted_iota(jnp.int32, z.shape, 1)
    z = jnp.where(lane < v_real, z, NEG)                      # mask padded vocab lanes
    m = jnp.max(z, axis=-1, keepdims=True)
    lse = m + jnp.log(jnp.sum(jnp.exp(z - m), axis=-1, keepdims=True))
    o_ref[0] = (z - lse).astype(o_ref.dtype)                  # log_softmax (lane-dense store)


def _proj_tile_t(T):
    # x block's last dim is TILE_T -> must be a multiple of 128 or the full T.
    for cand in (512, 384, 256, 128):
        if T % cand == 0:
            return cand
    return T   # full-T fallback (always layout-legal); fine for moderate T.


def run_proj(x_bdt, drop_mask_btd, w1, b1, w2, b2, v_real):
    B, D, T = x_bdt.shape
    V_pad = w2.shape[1]
    tile_t = _proj_tile_t(T)
    grid = (B, T // tile_t)
    cost = pl.CostEstimate(
        flops=2 * B * T * D * (D + V_pad),
        transcendentals=B * T * V_pad,
        bytes_accessed=(4 * B * T * D            # x (f32)
                        + 2 * B * T * D          # dropout mask (bf16)
                        + 4 * B * T * V_pad      # log-probs out (f32)
                        + 2 * (D * D + D * V_pad) + 4 * (D + V_pad)))
    return pl.pallas_call(
        functools.partial(proj_kernel, v_real=v_real),
        out_shape=jax.ShapeDtypeStruct((B, T, V_pad), jnp.float32),
        grid=grid,
        in_specs=[
            pl.BlockSpec((1, D, tile_t), lambda b, t: (b, 0, t)),   # x, original layout
            pl.BlockSpec((1, tile_t, D), lambda b, t: (b, t, 0)),   # dropout mask
            pl.BlockSpec((D, D), lambda b, t: (0, 0)),              # W1 (resident)
            pl.BlockSpec((1, D), lambda b, t: (0, 0)),              # b1
            pl.BlockSpec((D, V_pad), lambda b, t: (0, 0)),          # W2 (resident)
            pl.BlockSpec((1, V_pad), lambda b, t: (0, 0)),          # b2
        ],
        out_specs=pl.BlockSpec((1, tile_t, V_pad), lambda b, t: (b, t, 0)),
        compiler_params=pltpu.CompilerParams(
            dimension_semantics=("parallel", "parallel")),
        cost_estimate=cost,
    )(x_bdt, drop_mask_btd, w1, b1, w2, b2)


# --------------------------------------------------------------------------
# Kernel 2: CTC loss (alpha recursion), G batch rows per grid step.
# --------------------------------------------------------------------------
def ctc_kernel(dec_len_ref, tgt_len_ref, logp_ref, tgt_ref, out_ref, lp_ext_ref,
               *, group, vocab):
    G = group
    T, Vp = logp_ref.shape[1], logp_ref.shape[2]
    L = tgt_ref.shape[2]
    S = lp_ext_ref.shape[1]
    blank = vocab - 1
    b0 = pl.program_id(0) * G

    # ---- static helper matrices (shared by every row of the group) ----
    l_ls = lax.broadcasted_iota(jnp.int32, (L, S), 0)
    s_ls = lax.broadcasted_iota(jnp.int32, (L, S), 1)
    m_t = (s_ls == 2 * l_ls + 1).astype(jnp.float32)          # label l -> odd ext-state 2l+1
    v_vs = lax.broadcasted_iota(jnp.int32, (Vp, S), 0)
    s_vs = lax.broadcasted_iota(jnp.int32, (Vp, S), 1)
    blank_cols = jnp.where((v_vs == blank) & (s_vs % 2 == 0), 1.0, 0.0)   # even states -> blank
    v_vl = lax.broadcasted_iota(jnp.int32, (Vp, L), 0)
    l_row = lax.broadcasted_iota(jnp.int32, (1, L), 1)

    row_iota = lax.broadcasted_iota(jnp.int32, (G, S), 0)
    s_lane = lax.broadcasted_iota(jnp.int32, (G, S), 1)

    skip = jnp.zeros((G, S), jnp.float32)
    dec_vec = jnp.zeros((G, S), jnp.int32)
    tgt_vec = jnp.zeros((G, S), jnp.int32)

    # ---- per-row setup (static unrolled loop over the group) ----
    for g in range(G):
        tgt_g = tgt_ref[g]                                    # (1, L) int32
        onehot = (v_vl == tgt_g).astype(jnp.float32)          # (Vp, L)
        e = jnp.dot(onehot, m_t, preferred_element_type=jnp.float32) + blank_cols
        # lp_ext[t, s] = logp[t, ext_label[s]]  (exact: one-hot matmul on the MXU)
        lp_ext_ref[pl.ds(g * T, T), :] = jnp.dot(
            logp_ref[g], e, preferred_element_type=jnp.float32)

        # skip transitions allowed at odd s >= 3 where label != previous label
        tgt_f = tgt_g.astype(jnp.float32)
        if L > 1:
            tgt_prev = jnp.concatenate(
                [jnp.full((1, 1), -1.0, jnp.float32), tgt_f[:, : L - 1]], axis=1)
            diff = ((tgt_f != tgt_prev) & (l_row >= 1)).astype(jnp.float32)
        else:
            diff = jnp.zeros((1, L), jnp.float32)
        skip_g = jnp.dot(diff, m_t, preferred_element_type=jnp.float32)   # (1, S)
        skip = jnp.where(row_iota == g, skip_g, skip)

        dec_vec = jnp.where(row_iota == g, dec_len_ref[b0 + g], dec_vec)
        tgt_vec = jnp.where(row_iota == g, tgt_len_ref[b0 + g], tgt_vec)

    # ---- loop-invariant values hoisted out of the recursion ----
    skip_ok = skip > 0.5
    neg1 = jnp.full((G, 1), NEG, jnp.float32)
    neg2 = jnp.full((G, 2), NEG, jnp.float32)

    def lp_row(t):
        rows = [lp_ext_ref[pl.ds(g * T + t, 1), :] for g in range(G)]
        return rows[0] if G == 1 else jnp.concatenate(rows, axis=0)       # (G, S)

    # ---- init (t = 0) ----
    lp0 = lp_row(0)
    init_mask = (s_lane == 0) | ((s_lane == 1) & (tgt_vec >= 1))
    alpha0 = jnp.where(init_mask, lp0, NEG)

    # ---- alpha recursion, bounded by the group's max decoder length ----
    t_hi = dec_len_ref[b0]
    for g in range(1, G):
        t_hi = jnp.maximum(t_hi, dec_len_ref[b0 + g])
    t_hi = jnp.minimum(t_hi, T)

    def body(t, alpha):
        a1 = jnp.concatenate([neg1, alpha[:, : S - 1]], axis=1)           # alpha[s-1]
        a2 = jnp.concatenate([neg2, alpha[:, : S - 2]], axis=1)           # alpha[s-2]
        a2 = jnp.where(skip_ok, a2, NEG)
        m = jnp.maximum(jnp.maximum(alpha, a1), a2)
        tot = m + jnp.log(jnp.exp(alpha - m) + jnp.exp(a1 - m) + jnp.exp(a2 - m))
        new_alpha = tot + lp_row(t)
        return jnp.where(t < dec_vec, new_alpha, alpha)                   # ragged lengths

    alpha = lax.fori_loop(1, t_hi, body, alpha0)

    # ---- final states: s = 2*tgt_len and s = 2*tgt_len - 1 ----
    s_last = 2 * tgt_vec
    fin = (s_lane == s_last) | ((s_lane == s_last - 1) & (tgt_vec >= 1))
    masked = jnp.where(fin, alpha, NEG)
    mmax = jnp.max(masked, axis=-1, keepdims=True)
    lse = mmax + jnp.log(jnp.sum(jnp.exp(masked - mmax), axis=-1, keepdims=True))
    loss = -lse                                                           # (G, 1)
    for g in range(G):
        out_ref[g] = jnp.broadcast_to(loss[g:g + 1, :], (1, S)).astype(out_ref.dtype)


def _ctc_group(B):
    for cand in (8, 7, 6, 5, 4, 3, 2, 1):
        if cand <= B and B % cand == 0:
            return cand
    return 1


def run_ctc(logp, targets, decoder_lengths, target_lengths, vocab):
    B, T, V_pad = logp.shape
    L = targets.shape[1]
    S = max(128, _round_up(2 * L + 1, 128))     # extended-label axis, lane-aligned
    G = _ctc_group(B)
    targets3 = targets.astype(jnp.int32).reshape(B, 1, L)
    dec = decoder_lengths.astype(jnp.int32)
    tgt = target_lengths.astype(jnp.int32)
    cost = pl.CostEstimate(
        flops=2 * B * T * V_pad * S + 2 * B * V_pad * L * S + 12 * B * T * S,
        transcendentals=4 * B * T * S,
        bytes_accessed=4 * B * T * V_pad + 4 * B * (L + 2) + 4 * B * S)
    out = pl.pallas_call(
        functools.partial(ctc_kernel, group=G, vocab=vocab),
        out_shape=jax.ShapeDtypeStruct((B, 1, S), jnp.float32),
        grid_spec=pltpu.PrefetchScalarGridSpec(
            num_scalar_prefetch=2,
            grid=(B // G,),
            in_specs=[
                pl.BlockSpec((G, T, V_pad), lambda b, dl, tl: (b, 0, 0)),
                pl.BlockSpec((G, 1, L), lambda b, dl, tl: (b, 0, 0)),
            ],
            out_specs=pl.BlockSpec((G, 1, S), lambda b, dl, tl: (b, 0, 0)),
            scratch_shapes=[pltpu.VMEM((G * T, S), jnp.float32)],
        ),
        compiler_params=pltpu.CompilerParams(dimension_semantics=("parallel",)),
        cost_estimate=cost,
    )(dec, tgt, logp, targets3)
    return out[:, 0, 0]


# --------------------------------------------------------------------------
# Module wrapper
# --------------------------------------------------------------------------
def mi_estimator_forward(params, decoder_outputs, target_text,
                         decoder_lengths, target_lengths, dropout_key):
    """decoder_outputs: (B, decoder_rnn_dim, T) -- same layout as the PyTorch module."""
    B, D, T = decoder_outputs.shape
    V = params["w2"].shape[1]
    V_pad = max(128, _round_up(V, 128))

    w1 = params["w1"].astype(jnp.bfloat16)
    b1 = params["b1"].reshape(1, D).astype(jnp.float32)
    w2 = jnp.pad(params["w2"], ((0, 0), (0, V_pad - V))).astype(jnp.bfloat16)
    b2 = jnp.pad(params["b2"].reshape(1, V), ((0, 0), (0, V_pad - V))).astype(jnp.float32)

    # Dropout p=0.5 (module default), training mode: keep w.p. 0.5, scale by 2.
    keep = jax.random.bernoulli(dropout_key, 0.5, (B, T, D))
    drop_mask = keep.astype(jnp.bfloat16) * 2.0

    logp = run_proj(decoder_outputs, drop_mask, w1, b1, w2, b2, v_real=V)   # (B, T, V_pad)
    ctc = run_ctc(logp, target_text, decoder_lengths, target_lengths, vocab=V)
    # zero_infinity=True: infeasible alignments (loss ~ +1e30) -> 0
    ctc = jnp.where(jnp.isfinite(ctc) & (ctc < 1e29), ctc, 0.0)
    return jnp.mean(ctc / decoder_lengths.astype(jnp.float32))


def xavier_uniform(key, fan_in, fan_out, gain):
    bound = gain * jnp.sqrt(6.0 / (fan_in + fan_out))
    return jax.random.uniform(key, (fan_in, fan_out), jnp.float32, -bound, bound)


if __name__ == "__main__":
    B, D, T, V, L = 2, 32, 16, 30, 6    # batch, decoder_rnn_dim, frames, ctc vocab, max tgt len
    key = jax.random.PRNGKey(0)
    k_x, k_t, k_w1, k_w2, k_drop = jax.random.split(key, 5)

    decoder_outputs = jax.random.normal(k_x, (B, D, T), jnp.float32)
    target_text = jax.random.randint(k_t, (B, L), 0, V - 1, jnp.int32)  # labels exclude blank (V-1)
    decoder_lengths = jnp.array([16, 12], jnp.int32)
    target_lengths = jnp.array([5, 4], jnp.int32)

    params = {
        "w1": xavier_uniform(k_w1, D, D, gain=jnp.sqrt(2.0)),   # LinearNorm xavier_uniform, relu gain
        "b1": jnp.zeros((1, D), jnp.float32),
        "w2": xavier_uniform(k_w2, D, V, gain=1.0),             # ctc_proj, linear gain
        "b2": jnp.zeros((1, V), jnp.float32),
    }

    loss = mi_estimator_forward(params, decoder_outputs, target_text,
                                decoder_lengths, target_lengths, k_drop)
    loss = jax.block_until_ready(loss)
    assert loss.shape == () and bool(jnp.isfinite(loss))
    print("KERNEL_OK")
</pallas_src>

<mosaic_0001>
module attributes {stable_mosaic.version = 11 : i64} {
  func.func @proj_kernel(%arg0: i32, %arg1: i32, %arg2: memref<1x32x16xf32, #tpu.memory_space<vmem>>, %arg3: memref<1x16x32xbf16, #tpu.memory_space<vmem>>, %arg4: memref<32x32xbf16, #tpu.memory_space<vmem>>, %arg5: memref<1x32xf32, #tpu.memory_space<vmem>>, %arg6: memref<32x128xbf16, #tpu.memory_space<vmem>>, %arg7: memref<1x128xf32, #tpu.memory_space<vmem>>, %arg8: memref<1x16x128xf32, #tpu.memory_space<vmem>>) attributes {dimension_semantics = [#tpu.dimension_semantics<parallel>, #tpu.dimension_semantics<parallel>], iteration_bounds = array<i64: 2, 1>, scalar_prefetch = 0 : i64, scratch_operands = 0 : i64, tpu.core_type = #tpu.core_type<tc>, window_params = [{transform_indices = @transform_0, window_bounds = array<i64: 1, 32, 16>}, {transform_indices = @transform_1, window_bounds = array<i64: 1, 16, 32>}, {pipeline_mode = #tpu.pipeline_mode<synchronous>, transform_indices = @transform_2, window_bounds = array<i64: 32, 32>}, {pipeline_mode = #tpu.pipeline_mode<synchronous>, transform_indices = @transform_3, window_bounds = array<i64: 1, 32>}, {pipeline_mode = #tpu.pipeline_mode<synchronous>, transform_indices = @transform_4, window_bounds = array<i64: 32, 128>}, {pipeline_mode = #tpu.pipeline_mode<synchronous>, transform_indices = @transform_5, window_bounds = array<i64: 1, 128>}, {transform_indices = @transform_6, window_bounds = array<i64: 1, 16, 128>}]} {
    %c0 = arith.constant 0 : index
    %c0_0 = arith.constant 0 : index
    %c0_1 = arith.constant 0 : index
    %0 = vector.load %arg2[%c0, %c0_0, %c0_1] : memref<1x32x16xf32, #tpu.memory_space<vmem>>, vector<1x32x16xf32>
    %1 = vector.shape_cast %0 : vector<1x32x16xf32> to vector<32x16xf32>
    %2 = arith.truncf %1 : vector<32x16xf32> to vector<32x16xbf16>
    %c0_2 = arith.constant 0 : index
    %c0_3 = arith.constant 0 : index
    %3 = vector.load %arg4[%c0_2, %c0_3] : memref<32x32xbf16, #tpu.memory_space<vmem>>, vector<32x32xbf16>
    %cst = arith.constant dense<0.000000e+00> : vector<16x32xf32>
    %4 = tpu.matmul %2, %3, %cst {dimension_numbers = #tpu.dot_dimension_numbers<[0], [0], [1], [1], [0, 1, 1, 1], [], []>} : vector<32x16xbf16>, vector<32x32xbf16>, vector<16x32xf32> -> vector<16x32xf32>
    %c0_4 = arith.constant 0 : index
    %c0_5 = arith.constant 0 : index
    %5 = vector.load %arg5[%c0_4, %c0_5] : memref<1x32xf32, #tpu.memory_space<vmem>>, vector<1x32xf32>
    %6 = vector.broadcast %5 : vector<1x32xf32> to vector<16x32xf32>
    %7 = arith.addf %4, %6 : vector<16x32xf32>
    %cst_6 = arith.constant 0.000000e+00 : f32
    %8 = vector.broadcast %cst_6 : f32 to vector<16x32xf32>
    %9 = arith.maximumf %7, %8 : vector<16x32xf32>
    %c0_7 = arith.constant 0 : index
    %c0_8 = arith.constant 0 : index
    %c0_9 = arith.constant 0 : index
    %10 = vector.load %arg3[%c0_7, %c0_8, %c0_9] : memref<1x16x32xbf16, #tpu.memory_space<vmem>>, vector<1x16x32xbf16>
    %11 = vector.shape_cast %10 : vector<1x16x32xbf16> to vector<16x32xbf16>
    %12 = arith.extf %11 : vector<16x32xbf16> to vector<16x32xf32>
    %13 = arith.mulf %9, %12 : vector<16x32xf32>
    %14 = arith.truncf %13 : vector<16x32xf32> to vector<16x32xbf16>
    %c0_10 = arith.constant 0 : index
    %c0_11 = arith.constant 0 : index
    %15 = vector.load %arg6[%c0_10, %c0_11] : memref<32x128xbf16, #tpu.memory_space<vmem>>, vector<32x128xbf16>
    %cst_12 = arith.constant dense<0.000000e+00> : vector<16x128xf32>
    %16 = tpu.matmul %14, %15, %cst_12 {dimension_numbers = #tpu.dot_dimension_numbers<[1], [0], [0], [1], [0, 0, 1, 1], [], []>} : vector<16x32xbf16>, vector<32x128xbf16>, vector<16x128xf32> -> vector<16x128xf32>
    %c0_13 = arith.constant 0 : index
    %c0_14 = arith.constant 0 : index
    %17 = vector.load %arg7[%c0_13, %c0_14] : memref<1x128xf32, #tpu.memory_space<vmem>>, vector<1x128xf32>
    %18 = vector.broadcast %17 : vector<1x128xf32> to vector<16x128xf32>
    %19 = arith.addf %16, %18 : vector<16x128xf32>
    %20 = tpu.iota {dimensions = array<i32: 1>} : vector<16x128xi32>
    %c30_i32 = arith.constant 30 : i32
    %21 = vector.broadcast %c30_i32 : i32 to vector<16x128xi32>
    %22 = arith.cmpi slt, %20, %21 : vector<16x128xi32>
    %cst_15 = arith.constant -1.000000e+30 : f32
    %23 = vector.broadcast %cst_15 : f32 to vector<16x128xf32>
    %24 = arith.select %22, %19, %23 : vector<16x128xi1>, vector<16x128xf32>
    %cst_16 = arith.constant dense<0xFF800000> : vector<16xf32>
    %25 = vector.multi_reduction <maximumf>, %24, %cst_16 [1] : vector<16x128xf32> to vector<16xf32>
    %26 = vector.shape_cast %25 : vector<16xf32> to vector<16x1xf32>
    %27 = vector.broadcast %26 : vector<16x1xf32> to vector<16x128xf32>
    %28 = arith.subf %24, %27 : vector<16x128xf32>
    %29 = math.exp %28 : vector<16x128xf32>
    %cst_17 = arith.constant dense<0.000000e+00> : vector<16xf32>
    %30 = vector.multi_reduction <add>, %29, %cst_17 [1] : vector<16x128xf32> to vector<16xf32>
    %31 = vector.shape_cast %30 : vector<16xf32> to vector<16x1xf32>
    %32 = math.log %31 : vector<16x1xf32>
    %33 = arith.addf %26, %32 : vector<16x1xf32>
    %34 = vector.broadcast %33 : vector<16x1xf32> to vector<16x128xf32>
    %35 = arith.subf %24, %34 : vector<16x128xf32>
    %c0_18 = arith.constant 0 : index
    %c0_19 = arith.constant 0 : index
    %c0_20 = arith.constant 0 : index
    %36 = vector.load %arg8[%c0_18, %c0_19, %c0_20] : memref<1x16x128xf32, #tpu.memory_space<vmem>>, vector<1x16x128xf32>
    %37 = vector.shape_cast %36 : vector<1x16x128xf32> to vector<16x128xf32>
    %38 = vector.shape_cast %35 : vector<16x128xf32> to vector<1x16x128xf32>
    tpu.vector_store %arg8[%c0_18, %c0_19, %c0_20], %38 {strides = array<i32>} : memref<1x16x128xf32, #tpu.memory_space<vmem>>, vector<1x16x128xf32>,
    return
  }
  func.func @transform_0(%arg0: i32, %arg1: i32) -> (i32, i32, i32) {
    %c0_i32 = arith.constant 0 : i32
    %c0_i32_0 = arith.constant 0 : i32
    return %arg0, %c0_i32, %arg1 : i32, i32, i32
  }
  func.func @transform_1(%arg0: i32, %arg1: i32) -> (i32, i32, i32) {
    %c0_i32 = arith.constant 0 : i32
    %c0_i32_0 = arith.constant 0 : i32
    return %arg0, %arg1, %c0_i32 : i32, i32, i32
  }
  func.func @transform_2(%arg0: i32, %arg1: i32) -> (i32, i32) {
    %c0_i32 = arith.constant 0 : i32
    %c0_i32_0 = arith.constant 0 : i32
    %c0_i32_1 = arith.constant 0 : i32
    return %c0_i32, %c0_i32_0 : i32, i32
  }
  func.func @transform_3(%arg0: i32, %arg1: i32) -> (i32, i32) {
    %c0_i32 = arith.constant 0 : i32
    %c0_i32_0 = arith.constant 0 : i32
    %c0_i32_1 = arith.constant 0 : i32
    return %c0_i32, %c0_i32_0 : i32, i32
  }
  func.func @transform_4(%arg0: i32, %arg1: i32) -> (i32, i32) {
    %c0_i32 = arith.constant 0 : i32
    %c0_i32_0 = arith.constant 0 : i32
    %c0_i32_1 = arith.constant 0 : i32
    return %c0_i32, %c0_i32_0 : i32, i32
  }
  func.func @transform_5(%arg0: i32, %arg1: i32) -> (i32, i32) {
    %c0_i32 = arith.constant 0 : i32
    %c0_i32_0 = arith.constant 0 : i32
    %c0_i32_1 = arith.constant 0 : i32
    return %c0_i32, %c0_i32_0 : i32, i32
  }
  func.func @transform_6(%arg0: i32, %arg1: i32) -> (i32, i32, i32) {
    %c0_i32 = arith.constant 0 : i32
    %c0_i32_0 = arith.constant 0 : i32
    return %arg0, %arg1, %c0_i32 : i32, i32, i32
  }
}

</mosaic_0001>

<bundles_post_ra>
// kernel: tpu_custom_call.1
= control target key start
LH: loop header
LB: loop body
LE: loop exit
PB: predicated region body
PF: predicated region fallthrough
CT: control target
= control target key end

     0   :  { %11 = vsyncpa [#allocation3], 0  ;;  %s1003_s0 = inlined_call_operand.vmem [shape: f32[2,32,16], index: 0, kind: input, shape index: {}]   ;;  %s1004_s1 = inlined_call_operand.vmem [shape: bf16[2,16,32], index: 1, kind: input, shape index: {}]   ;;  %s1005_s2 = inlined_call_operand.vmem [shape: bf16[32,32], index: 2, kind: input, shape index: {}]   ;;  %s1006_s3 = inlined_call_operand.vmem [shape: f32[1,32], index: 3, kind: input, shape index: {}]   ;;  %s1007_s4 = inlined_call_operand.vmem [shape: bf16[32,128], index: 4, kind: input, shape index: {}]   ;;  %s1008_s5 = inlined_call_operand.vmem [shape: f32[1,128], index: 5, kind: input, shape index: {}]   ;;  %s1009_s6 = inlined_call_operand.hbm [shape: f32[2,16,128], index: 6, kind: output, shape index: {}]  }
   0x1   :  { %13 = vsyncpa [#allocation3 + $0x1], 0  ;;  %s865_s21 = smov 0   ;;  %s867_s22 = smov 0  }
   0x2   :  { %s869_s23 = smov 0   ;;  %s871_s24 = smov 0  }
   0x3   :  { %s873_s25 = smov 0   ;;  %s875_s26 = smov 0  }
   0x4 LB: > { %s621_s27 = sadd.s32 4294967295, %s823_s26   ;;  %s622_s28 = sadd.s32 4294967294, %s823_s26   ;;  %s823_s26 = sphi %s875_s26, %s19_s26   ;;  %s819_s25 = sphi %s873_s25, %s1016_s25   ;;  %s815_s24 = sphi %s871_s24, %s1015_s24   ;;  %s811_s23 = sphi %s869_s23, %s1014_s23   ;;  %s807_s22 = sphi %s867_s22, %s1013_s22   ;;  %s803_s21 = sphi %s865_s21, %s1012_s21  }
   0x5   : > { %s31_s29 = sadd.s32 1, %s819_s25  ;;  %s180_s30 = sadd.s32 1, %s811_s23 }
   0x6   : > { %p33_p0 = scmp.ge.s32.totalorder %s31_s29, 2  ;;  %p190_p1 = scmp.ne.s32.totalorder %s811_s23, %s807_s22 }
   0x7   : > { %p191_p2 = scmp.eq.s32.totalorder %s621_s27, 1  ;;  %p196_p3 = scmp.ne.s32.totalorder %s807_s22, %s803_s21 }
   0x8   : > { %s1018_s29 = smov (%p33_p0, %s31_s29), 0  ;;  %p197_p5 = scmp.eq.s32.totalorder %s622_s28, 1 }
   0x9   : > { %p905_p4 = por %p191_p2, %p190_p1  ;;  %s175_s8 = ssub.s32 %s819_s25, %s1018_s29 }
   0xa   : > { %p625_p6 = scmp.ge.s32.totalorder %s823_s26, 1  ;;  %p178_p7 = scmp.eq.s32.totalorder %s175_s8, 0 }
   0xb   : > { %p912_p8 = por %p197_p5, %p196_p3  ;;  %p251_p9 = scmp.lt.s32.totalorder %s823_s26, 3 }
   0xc   : > { %s918_s10 = scalar_select %p178_p7, %s811_s23, %s180_s30  }
   0xd   : > { %p252_p10 = pnand %p625_p6, %p251_p9 }
   0xe   : > { %p293_p11 = scmp.lt.s32.totalorder (!%p252_p10), %s815_s24, 1  ;;  %v733_v0 = vld [vmem:[%s1005_s2] sm:$0xff] (!%p252_p10)   ;;  %v825_v1 = vmov (!%p252_p10), 0.0   ;;  %v734_v2 = vld [vmem:[%s1005_s2 + $0x8] sm:$0xff] (!%p252_p10)   ;;  %vm826_vm0 = vmmov (!%p252_p10), 0   ;;  %vm358_vm1 = vcmask (!%p252_p10), 261120   ;;  %v479_v27 = vlaneseq (!%p252_p10) }
   0xf   : > { %255 = sbr.rel (%p252_p10) target bundleno = 904 (0x388), region = 44  ;;  %657 = vmatprep.subr.bf16.mxu0 (!%p252_p10), %v825_v1  ;;  %665 = vmatprep.subr.bf16.mxu1 (!%p252_p10), %v825_v1  ;;  %v735_v10 = vld [vmem:[%s1007_s4] sm:$0xff] (!%p252_p10)   ;;  %v736_v11 = vld [vmem:[%s1007_s4 + $0x8] sm:$0xff] (!%p252_p10)   ;;  %s290_s18 = sand.u32 (!%p252_p10), 1, %s807_s22  }
  0x10   : > { %658 = vmatpush3.bf16.msra.mxu0 (!%p252_p10), %v733_v0  ;;  %661 = vmatprep.mubr.msk.bf16.mxu0 (!%p252_p10), %vm826_vm0, %v825_v1  ;;  %v631_v12 = vld [vmem:[%s1006_s3] ss:$0 sm:$0xff] (!%p252_p10)  ;;  %v480_v28 = vand.u32 (!%p252_p10), 127, %v479_v27  ;;  %s646_s20 = sshll.u32 (!%p252_p10), %s815_s24, 8  ;;  %s957_s12 = scalar_lea.sflag (!%p252_p10), [#allocation3], %s290_s18 }
  0x11   : > { %659 = vmatprep.subr.bf16.mxu0 (!%p252_p10), %v825_v1  ;;  %669 = vmatprep.mubr.msk.bf16.mxu1 (!%p252_p10), %vm826_vm0, %v825_v1  ;;  %v635_v29 = vld [vmem:[%s1008_s5] ss:$0 sm:$0xff] (!%p252_p10)  ;;  %s953_s11 = scalar_lea.hbm (!%p252_p10), %s1009_s6, %s646_s20 }
  0x12   : > { %666 = vmatpush3.bf16.msra.mxu1 (!%p252_p10), %v735_v10  ;;  %vm481_vm2 = vcmp.lt.s32.totalorder (!%p252_p10), %v480_v28, 30 }
  0x13   : > { %667 = vmatprep.subr.bf16.mxu1 (!%p252_p10), %v825_v1 }
  0x14   : > { %660 = vmatpush3.bf16.msra.mxu0 (!%p252_p10), %v734_v2 }
  0x16   : > { %s294_s13 = scalar_select %p293_p11, %s815_s24, 1  ;;  %668 = vmatpush3.bf16.msra.mxu1 %v736_v11 }
  0x17   : > { %s827_s24 = smov [#allocation2]  }
  0x18   : > { %s644_s16 = sshll.u32 %s294_s13, 5  ;;  %s645_s8 = sshll.u32 %s294_s13, 3 }
  0x19   : > { %s300_s19 = scalar_lea.vmem %s1003_s0, %s644_s16  ;;  %s309_s14 = scalar_lea.vmem %s1004_s1, %s645_s8 }
  0x1a   : > { %v313_v3 = vld [vmem:[%s300_s19] sm:$0xff]  ;;  %v314_v4 = vld [vmem:[%s300_s19 + $0x8] sm:$0xff]  ;;  %v315_v5 = vld [vmem:[%s300_s19 + $0x10] sm:$0xff]  ;;  %s749_s15 = sshll.u32 %s827_s24, 4  ;;  %s750_s15 = int_to_ptr.vmem [resolvable:$false] %s749_s15 }
  0x1b   : > { %v317_v6 = vpack.c.bf16 %v314_v4, %v313_v3  ;;  %v316_v7 = vld [vmem:[%s300_s19 + $0x18] sm:$0xff]  ;;  %v648_v13 = vld [vmem:[%s309_s14] sm:$0xff]   ;;  %s626_s19 = sshll.u32 %s290_s18, 4  ;;  %s751_s16 = scalar_lea.vmem %s750_s15, 512 }
  0x1c   : > { %v318_v8 = vpack.c.bf16 %v316_v7, %v315_v5  ;;  %v649_v16 = vunpack.c.l.bf16 %v648_v13  ;;  %v650_v21 = vunpack.c.h.bf16 %v648_v13  ;;  %s292_s27 = scalar_lea.vmem [#allocation2], %s626_s19 }
  0x1d   : > { %330 = vxpose.xlu0.c.b16.start [1/2] (short) (narrow) %v317_v6, 16  ;;  %s524_s28 = sshll.u32 %s292_s27, 4  ;;  %s955_s28 = int_to_ptr.vmem [resolvable:$true] %s524_s28 }
  0x1e   : > { %s745_s14 = scalar_lea.vmem %s955_s28, 256  ;;  %p752_p1 = scmp.lt.s32.totalorder %s955_s28, %s750_s15 }
  0x1f   : > { %p746_p12 = scmp.ne.s32.totalorder %s955_s28, %s745_s14  ;;  %p753_p2 = scmp.lt.s32.totalorder %s751_s16, %s745_s14 }
  0x21   : > { %331 = vxpose.xlu0.c.b16.end [2/2] (short) (narrow) %v318_v8, 16  ;;  %p747_p13 = pnand %p746_p12, %p905_p4  ;;  %p754_p3 = por %p753_p2, %p752_p1 }
  0x23   : > { %p748_p0 = pneg %p747_p13 }
  0x25   : > { %p755_p5 = pnand %p754_p3, %p748_p0 }
  0x83   : > { %v338_v9 = vpop.trf.xlu0 }
  0x84   : > { %662 = vmatmul.mubr.msk.bf16.vlgmr.msra.gmra.mrb[0].mxu0 %vm358_vm1, %v338_v9 }
 0x157   : > { %v396_v14 = vpop.f32.mrb[0].mxu0 }
 0x158   : > { %v397_v15 = vadd.f32 %v631_v12, %v396_v14  ;;  %v663_v17 = vpop.f32.mrb[1].mxu0 }
 0x159   : > { %v399_v18 = vpop.f32.mrb[2].mxu0 }
 0x15a   : > { %v403_v19 = vmax.f32 %v397_v15, 0.0  ;;  %v400_v20 = vadd.f32 %v631_v12, %v399_v18  ;;  %v664_v22 = vpop.f32.mrb[3].mxu0 }
 0x15c   : > { %v409_v23 = vmul.f32 %v649_v16, %v403_v19  ;;  %v404_v24 = vmax.f32 %v400_v20, 0.0 }
 0x15e   : > { %v410_v25 = vmul.f32 %v650_v21, %v404_v24 }
 0x160   : > { %v411_v26 = vpack.c.bf16 %v410_v25, %v409_v23 }
 0x162   : > { %670 = vmatmul.mubr.msk.bf16.vlgmr.msra.gmra.mrb[0].mxu1 %vm358_vm1, %v411_v26 }
 0x235   : > { %v472_v30 = vpop.f32.mrb[0].mxu1 }
 0x236   : > { %v473_v31 = vadd.f32 %v635_v29, %v472_v30  ;;  %v671_v32 = vpop.f32.mrb[1].mxu1 }
 0x237   : > { %v475_v33 = vpop.f32.mrb[2].mxu1 }
 0x238   : > { %v476_v34 = vadd.f32 %v635_v29, %v475_v33  ;;  %v672_v35 = vpop.f32.mrb[3].mxu1  ;;  %v482_v36 = vsel %vm481_vm2, %v473_v31, -1e+30 }
 0x239   : > { %484 = vmax.xlane.f32.xlu1 %v482_v36 }
 0x23a   : > { %v483_v37 = vsel %vm481_vm2, %v476_v34, -1e+30 }
 0x23d   : > { %486 = vmax.xlane.f32.xlu1 %v483_v37 }
 0x2c6   : > { %v485_v38 = vpop.xlane.xlu1 %484 }
 0x2c7   : > { %v488_v39 = vsub.f32 %v482_v36, %v485_v38 }
 0x2c9   : > { %v490_v40 = vmul.f32 1.442695, %v488_v39 }
 0x2ca   : > { %v487_v41 = vpop.xlane.xlu1 %486 }
 0x2cb   : > { %737 = vpow2.f32 %v490_v40  ;;  %v489_v42 = vsub.f32 %v483_v37, %v487_v41 }
 0x2cd   : > { %v492_v43 = vmul.f32 1.442695, %v489_v42 }
 0x2cf   : > { %739 = vpow2.f32 %v492_v43 }
 0x2d5   : > { %v738_v44 = vpop.eup %737 }
 0x2d6   : > { %494 = vadd.xlane.f32.xlu0 %v738_v44 }
 0x2d9   : > { %v740_v45 = vpop.eup %739 }
 0x2da   : > { %496 = vadd.xlane.f32.xlu1 %v740_v45 }
 0x363   : > { %v495_v46 = vpop.xlane.xlu0 %494 }
 0x364   : > { %741 = vlog2.f32 %v495_v46 }
 0x367   : > { %v497_v47 = vpop.xlane.xlu1 %496 }
 0x368   : > { %743 = vlog2.f32 %v497_v47 }
 0x36e   : > { %v742_v48 = vpop.eup %741 }
 0x36f   : > { %v499_v49 = vmul.f32 0.6931472, %v742_v48 }
 0x371   : > { %v502_v50 = vadd.f32 %v499_v49, %v485_v38 }
 0x372   : > { %v744_v51 = vpop.eup %743 }
 0x373   : > { %v504_v52 = vsub.f32 %v482_v36, %v502_v50  ;;  %v501_v53 = vmul.f32 0.6931472, %v744_v51 }
 0x375   : > { %506 = vst [vmem:[%s292_s27] sm:$0xff] %v504_v52  ;;  %v503_v54 = vadd.f32 %v501_v53, %v487_v41 }
 0x377   : > { %v505_v55 = vsub.f32 %v483_v37, %v503_v54 }
 0x379   : > { %507 = vst [vmem:[%s292_s27 + $0x8] sm:$0xff] %v505_v55 }
 0x37a   : > { %758 = shalt.err (!%p755_p5)
}
 0x37b   : > { %s759_s13 = scalar_lea.hbm %s953_s11, 256  ;;  %s763_s19 = scalar_lea.hbm %s1009_s6, 512 }
 0x37c   : > { %p760_p6 = scmp.ne.s32.totalorder %s953_s11, %s759_s13  ;;  %p764_p10 = scmp.lt.u32.totalorder %s953_s11, %s1009_s6 }
 0x37d   : > { %p765_p11 = scmp.lt.u32.totalorder %s763_s19, %s759_s13  ;;  %p767_p13 = scmp.lt.u32.totalorder %s759_s13, %s953_s11 }
 0x37e   : > { %p761_p7 = pnand %p760_p6, %p905_p4 }
 0x37f   : > { %p766_p12 = por %p765_p11, %p764_p10 }
 0x380   : > { %p762_p9 = pneg %p761_p7 }
 0x381   : > { %p768_p0 = por %p767_p13, %p766_p12 }
 0x383   : > { %p769_p1 = pnand %p768_p0, %p762_p9 }
 0x385   : > { %772 = shalt.err (!%p769_p1)
}
 0x386   : > { %s828_s30 = smov 128   ;;  %s829_s8 = smov 8  }
 0x387   : > { %673 = dma.vmem_to_hbm [thread:$0]  (%p905_p4), %s955_s28, 256, %s953_s11, %s957_s12, %s828_s30, %s828_s30, %s829_s8  }
 0x388 PF: > { %p679_p2 = scmp.ge.s32.totalorder %s823_s26, 2  ;;  %s539_s14 = sand.u32 1, %s803_s21  }
 0x389   : > { %s540_s24 = scalar_lea.sflag [#allocation3], %s539_s14 }
 0x38a   : > { %p676_p3 = pnand %p679_p2, %p912_p8 }
 0x38c   : > { %798 = dma.done.wait (!%p676_p3), %s540_s24, 256  }
 0x38d   : > { %800 = vsyncadd (!%p676_p3), %s540_s24, 4294967040  ;;  %s19_s26 = sadd.s32 1, %s823_s26   ;;  %s1012_s21 = smov %s807_s22 }
 0x38e   : > { %p16_p5 = scmp.ge.s32.totalorder %s19_s26, 4   ;;  %s1013_s22 = smov %s811_s23 }
 0x38f   : > { %s1014_s23 = smov %s918_s10  ;;  %s1015_s24 = smov %s819_s25 }
 0x390   : > { %s1016_s25 = smov %s1018_s29  ;;  %18 = sbr.rel (!%p16_p5) target bundleno = 4 (0x4), region = 82 }
 0x397   :  { %545 = vsyncpa [#allocation3], 1 }
 0x398   :  { %547 = vsyncpa [#allocation3 + $0x1], 1 }

</bundles_post_ra>
